<compile_context>
chip_gen: v7x
topology: tpu7x:2x2x1
jax: 0.10.0
libtpu: 0.0.40
codegen_flags: <defaults>
</compile_context>

<pallas_src>
import math

import jax
import jax.numpy as jnp
from jax.experimental import pallas as pl
from jax.experimental.pallas import tpu as pltpu

# ----------------------------- dimensions ------------------------------------
B = 2               # batch
S = 16              # sequence length
H = 32              # hidden size
F = 64              # FFN intermediate size
NUM_HEADS = 2
HEAD_DIM = H // NUM_HEADS
VOCAB = 100
MAX_NUM_LABELS = 4  # L
LN_EPS = 1e-12

BS = B * S                      # batch folded into sublanes
BL = B * MAX_NUM_LABELS         # number of real scores
OUT_LANES = 128                 # lane-dense padded score row

ACT_ROWS = BS + 2 * BS + OUT_LANES      # x | head-stacked bias | padded one-hot
W_ROWS = H + F                          # 96
W_COLS = 384                            # 128-lane-aligned matrix starts
_VEC_ROWS = 16
_VEC_COLS = 128

# bias / vector slab row indices (one packed (16,128) f32 VMEM input)
(_R_BQKV, _R_BO, _R_LN1G, _R_LN1B, _R_B1, _R_B2,
 _R_LN2G, _R_LN2B, _R_WCLS, _R_BCLS, _R_HM0, _R_HM1) = range(12)


# -------------------------- shared math helpers -------------------------------
def _softmax(x):
    m = jnp.max(x, axis=-1, keepdims=True)
    e = jnp.exp(x - m)
    return e / jnp.sum(e, axis=-1, keepdims=True)


def _layer_norm(x, g, b):
    # mean and E[x^2] are independent row reductions -> the two XLU reduces can
    # overlap instead of var waiting on mu (var = E[x^2] - mu^2).
    mu = jnp.mean(x, axis=-1, keepdims=True)
    ms = jnp.mean(x * x, axis=-1, keepdims=True)
    var = ms - mu * mu
    return (x - mu) * jax.lax.rsqrt(var + LN_EPS) * g + b


def _gelu(x):
    c = math.sqrt(2.0 / math.pi)
    return 0.5 * x * (1.0 + jnp.tanh(c * (x + 0.044715 * x * x * x)))


# ------------------------------ fused Pallas kernel ----------------------------
# Single grid step: encoder layer + CLS gather + classifier for the whole batch.
def cross_encoder_kernel(act_ref, w_ref, vec_ref, scores_ref):
    bf16 = jnp.bfloat16

    # activation slab (f32): [ x ; attn_bias (tiled for 2 stacked heads) ; onehot ]
    x = act_ref[0:BS, :]                              # (B*S, H)
    ab = act_ref[BS:3 * BS, :]                        # (2*B*S, B*S) additive bias
    oh = act_ref[3 * BS:3 * BS + OUT_LANES, :]        # (128, B*S) zero-padded gather

    # bf16 weight slab; every matrix starts at a 128-lane-aligned column.
    wqkv = w_ref[0:H, 0:3 * H]                        # fused Q|K|V projection (H, 3H)
    w1 = w_ref[0:H, 128:128 + F]                      # (H, F)
    wo = w_ref[0:H, 256:256 + H]                      # (H, H)
    w2 = w_ref[H:H + F, 0:H]                          # (F, H)

    # f32 bias / vector slab (one DMA for every (1, n) vector).
    bqkv = vec_ref[_R_BQKV:_R_BQKV + 1, 0:3 * H]
    bo = vec_ref[_R_BO:_R_BO + 1, 0:H]
    g1 = vec_ref[_R_LN1G:_R_LN1G + 1, 0:H]
    be1 = vec_ref[_R_LN1B:_R_LN1B + 1, 0:H]
    b1 = vec_ref[_R_B1:_R_B1 + 1, 0:F]
    b2 = vec_ref[_R_B2:_R_B2 + 1, 0:H]
    g2 = vec_ref[_R_LN2G:_R_LN2G + 1, 0:H]
    be2 = vec_ref[_R_LN2B:_R_LN2B + 1, 0:H]
    wcls = vec_ref[_R_WCLS:_R_WCLS + 1, 0:H]
    bcls = vec_ref[_R_BCLS:_R_BCLS + 1, 0:1]
    hm0 = vec_ref[_R_HM0:_R_HM0 + 1, 0:H]             # head-0 lane mask (pre-baked)
    hm1 = vec_ref[_R_HM1:_R_HM1 + 1, 0:H]             # head-1 lane mask (pre-baked)

    xb = x.astype(bf16)

    # Fused QKV projection: one bf16 MXU matmul, biases added in f32.
    qkv = jnp.dot(xb, wqkv, preferred_element_type=jnp.float32) + bqkv
    q = qkv[:, 0:H]
    k = qkv[:, H:2 * H]
    v = qkv[:, 2 * H:3 * H]

    # Both heads stacked on the sublane axis: masking q's lanes per head makes the
    # full-H contraction equal the per-head contraction, so ONE scores matmul, ONE
    # softmax and ONE AV matmul cover both heads.  The V lane mask commutes to the
    # output columns, so the per-head merge is a pair of VPU multiplies + add.
    scale = 1.0 / math.sqrt(HEAD_DIM)
    qs = jnp.concatenate([q * hm0, q * hm1], axis=0).astype(bf16)    # (2*B*S, H)
    kb = k.astype(bf16)
    sc = jax.lax.dot_general(qs, kb, (((1,), (1,)), ((), ())),
                             preferred_element_type=jnp.float32)     # (2*B*S, B*S)
    sc = sc * scale + ab
    m = jnp.max(sc, axis=-1, keepdims=True)
    e = jnp.exp(sc - m)
    att = e / jnp.sum(e, axis=-1, keepdims=True)                     # exact, f32
    av = jnp.dot(att.astype(bf16), v.astype(bf16),
                 preferred_element_type=jnp.float32)                 # (2*B*S, H)
    ctx = av[0:BS, :] * hm0 + av[BS:2 * BS, :] * hm1                 # (B*S, H)

    attn_out = jnp.dot(ctx.astype(bf16), wo,
                       preferred_element_type=jnp.float32) + bo
    h1 = _layer_norm(x + attn_out, g1, be1)                          # f32 residual+LN
    ff = _gelu(jnp.dot(h1.astype(bf16), w1,
                       preferred_element_type=jnp.float32) + b1)
    ff = jnp.dot(ff.astype(bf16), w2, preferred_element_type=jnp.float32) + b2
    hidden = _layer_norm(h1 + ff, g2, be2)

    # CLS gather on the MXU with a 128-row block-diagonal one-hot (invalid / padded
    # rows are all-zero, so their scores reduce to the classifier bias — same as the
    # reference), then the Linear(H -> 1) classifier.  Kept in f32 (tiny matmuls)
    # and stored once as a lane-dense (1, 128) row (unmasked vst).
    g = jnp.dot(oh, hidden, preferred_element_type=jnp.float32)      # (128, H)
    s = jax.lax.dot_general(wcls, g, (((1,), (1,)), ((), ())),
                            preferred_element_type=jnp.float32)      # (1, 128)
    scores_ref[...] = s + bcls


def cross_encoder_pallas(act_slab, w_slab, vec_slab):
    def full(shape):
        return pl.BlockSpec(shape, lambda i, _n=len(shape): (0,) * _n)

    return pl.pallas_call(
        cross_encoder_kernel,
        out_shape=jax.ShapeDtypeStruct((1, OUT_LANES), jnp.float32),
        grid=(1,),
        in_specs=[full(act_slab.shape), full(w_slab.shape), full(vec_slab.shape)],
        out_specs=pl.BlockSpec((1, OUT_LANES), lambda i: (0, 0)),
        compiler_params=pltpu.CompilerParams(dimension_semantics=("arbitrary",)),
    )(act_slab, w_slab, vec_slab)


# ------------------------------ weight packing ---------------------------------
def pack_weights(p):
    # matrix slab (bf16): wqkv @ col 0, w1 @ col 128, wo @ col 256, w2 @ rows H:H+F
    w = jnp.zeros((W_ROWS, W_COLS), jnp.float32)
    wqkv = jnp.concatenate([p['wq'], p['wk'], p['wv']], axis=1)          # (H, 3H)
    w = w.at[0:H, 0:3 * H].set(wqkv)
    w = w.at[0:H, 128:128 + F].set(p['w1'])
    w = w.at[0:H, 256:256 + H].set(p['wo'])
    w = w.at[H:H + F, 0:H].set(p['w2'])
    w_slab = w.astype(jnp.bfloat16)                                      # (96, 384)

    def row(v):
        v = jnp.asarray(v, jnp.float32).reshape(1, -1)
        return jnp.pad(v, ((0, 0), (0, _VEC_COLS - v.shape[1])))

    lane = jnp.arange(H)
    rows = [
        row(jnp.concatenate([p['bq'], p['bk'], p['bv']], axis=1)),       # _R_BQKV
        row(p['bo']),                                                    # _R_BO
        row(p['ln1_g']), row(p['ln1_b']),                                # _R_LN1G/B
        row(p['b1']), row(p['b2']),                                      # _R_B1/B2
        row(p['ln2_g']), row(p['ln2_b']),                                # _R_LN2G/B
        row(p['cls_w']),                                                 # _R_WCLS
        row(p['cls_b'].reshape(1, 1)),                                   # _R_BCLS
        row((lane // HEAD_DIM == 0).astype(jnp.float32)),                # _R_HM0
        row((lane // HEAD_DIM == 1).astype(jnp.float32)),                # _R_HM1
    ]
    rows.append(jnp.zeros((_VEC_ROWS - len(rows), _VEC_COLS), jnp.float32))
    vec_slab = jnp.concatenate(rows, axis=0)                             # (16, 128)
    return w_slab, vec_slab


# ------------------------------ full forward ----------------------------------
def forward(params, input_ids, attention_mask, cls_positions, cls_counts):
    Bn, Sn = input_ids.shape
    L = cls_positions.shape[1]

    # embeddings + embedding LayerNorm (plain-JAX glue, f32)
    x = params['tok_emb'][input_ids] + params['pos_emb'][None, :, :]
    x = _layer_norm(x, params['emb_ln_g'], params['emb_ln_b'])
    x_flat = x.reshape(Bn * Sn, H).astype(jnp.float32)

    # block-diagonal additive attention bias: query i may attend key j iff the key
    # belongs to the same example and is unmasked; tiled twice for the two
    # sublane-stacked heads.
    ex = jnp.arange(Bn * Sn) // Sn
    key_ok = attention_mask.reshape(Bn * Sn) > 0
    allowed = (ex[:, None] == ex[None, :]) & key_ok[None, :]
    attn_bias = jnp.where(allowed, 0.0, -1e9).astype(jnp.float32)        # (B*S, B*S)
    attn_bias2 = jnp.concatenate([attn_bias, attn_bias], axis=0)         # (2*B*S, B*S)

    # block-diagonal one-hot CLS-gather matrix (invalid label slots zeroed), padded
    # to 128 rows so the classifier emits one lane-dense score row.
    valid = jnp.arange(L)[None, :] < cls_counts[:, None]                 # (B, L)
    oh_local = cls_positions[:, :, None] == jnp.arange(Sn)[None, None, :]
    oh_local = (oh_local & valid[:, :, None]).astype(jnp.float32)        # (B, L, S)
    eye_b = jnp.eye(Bn, dtype=jnp.float32)
    onehot = (eye_b[:, None, :, None] * oh_local[:, :, None, :]
              ).reshape(Bn * L, Bn * Sn)                                 # (B*L, B*S)
    onehot_pad = jnp.zeros((OUT_LANES, Bn * Sn), jnp.float32
                           ).at[0:Bn * L, :].set(onehot)                 # (128, B*S)

    # single activation slab -> 3 input DMAs per kernel call instead of 5
    act_slab = jnp.concatenate([x_flat, attn_bias2, onehot_pad], axis=0)  # (224, 32)

    w_slab, vec_slab = pack_weights(params)
    scores_row = cross_encoder_pallas(act_slab, w_slab, vec_slab)        # (1, 128)
    scores = scores_row[0, 0:Bn * L].reshape(Bn, L)
    mask_labels = valid.astype(jnp.float32)          # depends only on cls_counts
    return scores, mask_labels


# ------------------------------ pure-JAX reference -----------------------------
def reference_forward(params, input_ids, attention_mask, cls_positions, cls_counts):
    x = params['tok_emb'][input_ids] + params['pos_emb'][None, :, :]
    x = _layer_norm(x, params['emb_ln_g'], params['emb_ln_b'])

    Bn, Sn, Hn = x.shape
    neg = (1.0 - attention_mask.astype(jnp.float32))[:, None, None, :] * (-1e9)
    q = jnp.einsum('bsh,hk->bsk', x, params['wq']) + params['bq']
    k = jnp.einsum('bsh,hk->bsk', x, params['wk']) + params['bk']
    v = jnp.einsum('bsh,hk->bsk', x, params['wv']) + params['bv']
    qh = q.reshape(Bn, Sn, NUM_HEADS, HEAD_DIM).transpose(0, 2, 1, 3)
    kh = k.reshape(Bn, Sn, NUM_HEADS, HEAD_DIM).transpose(0, 2, 1, 3)
    vh = v.reshape(Bn, Sn, NUM_HEADS, HEAD_DIM).transpose(0, 2, 1, 3)
    sc = jnp.einsum('bnqd,bnkd->bnqk', qh, kh) * (1.0 / math.sqrt(HEAD_DIM)) + neg
    att = _softmax(sc)
    ctx = jnp.einsum('bnqk,bnkd->bnqd', att, vh).transpose(0, 2, 1, 3).reshape(Bn, Sn, Hn)
    attn_out = jnp.einsum('bsh,hk->bsk', ctx, params['wo']) + params['bo']
    h1 = _layer_norm(x + attn_out, params['ln1_g'], params['ln1_b'])
    ff = _gelu(jnp.einsum('bsh,hf->bsf', h1, params['w1']) + params['b1'])
    ff = jnp.einsum('bsf,fh->bsh', ff, params['w2']) + params['b2']
    hidden = _layer_norm(h1 + ff, params['ln2_g'], params['ln2_b'])

    L = cls_positions.shape[1]
    valid = jnp.arange(L)[None, :] < cls_counts[:, None]                       # (B, L)
    g = jnp.take_along_axis(hidden, cls_positions[:, :, None], axis=1)         # (B, L, H)
    g = jnp.where(valid[:, :, None], g, 0.0)
    scores = jnp.einsum('blh,oh->blo', g, params['cls_w'])[..., 0] + params['cls_b'][0]
    return scores, valid.astype(jnp.float32)


# ------------------------------ parameter init ---------------------------------
def init_params(key):
    ks = jax.random.split(key, 12)

    def nrm(k, shape):
        return (0.02 * jax.random.normal(k, shape)).astype(jnp.float32)

    return {
        'tok_emb': nrm(ks[0], (VOCAB, H)),
        'pos_emb': nrm(ks[1], (S, H)),
        'emb_ln_g': jnp.ones((1, H), jnp.float32),
        'emb_ln_b': jnp.zeros((1, H), jnp.float32),
        'wq': nrm(ks[2], (H, H)), 'bq': jnp.zeros((1, H), jnp.float32),
        'wk': nrm(ks[3], (H, H)), 'bk': jnp.zeros((1, H), jnp.float32),
        'wv': nrm(ks[4], (H, H)), 'bv': jnp.zeros((1, H), jnp.float32),
        'wo': nrm(ks[5], (H, H)), 'bo': jnp.zeros((1, H), jnp.float32),
        'ln1_g': jnp.ones((1, H), jnp.float32), 'ln1_b': jnp.zeros((1, H), jnp.float32),
        'w1': nrm(ks[6], (H, F)), 'b1': jnp.zeros((1, F), jnp.float32),
        'w2': nrm(ks[7], (F, H)), 'b2': jnp.zeros((1, H), jnp.float32),
        'ln2_g': jnp.ones((1, H), jnp.float32), 'ln2_b': jnp.zeros((1, H), jnp.float32),
        'cls_w': nrm(ks[8], (1, H)),                 # nn.Linear(H, 1).weight
        'cls_b': nrm(ks[9], (1,)),                   # nn.Linear(H, 1).bias
    }


# ----------------------------------- main --------------------------------------
if __name__ == "__main__":
    key = jax.random.PRNGKey(0)
    pkey, dkey = jax.random.split(key)
    params = init_params(pkey)

    # deterministic example inputs (what the tokenizer / _build_crossencoder_inputs
    # would have produced)
    input_ids = jax.random.randint(dkey, (B, S), 0, VOCAB, dtype=jnp.int32)
    attention_mask = jnp.ones((B, S), jnp.int32).at[1, 12:].set(0)
    # per-example [CLS] positions of each label, zero-padded to MAX_NUM_LABELS
    cls_positions = jnp.array([[1, 5, 9, 0],
                               [2, 7, 0, 0]], dtype=jnp.int32)
    cls_counts = jnp.array([3, 2], dtype=jnp.int32)   # number of real labels per example

    fwd = jax.jit(forward)
    scores, mask_labels = fwd(params, input_ids, attention_mask, cls_positions, cls_counts)
    jax.block_until_ready((scores, mask_labels))

    ref_scores, ref_mask = reference_forward(params, input_ids, attention_mask,
                                             cls_positions, cls_counts)
    assert scores.shape == (B, MAX_NUM_LABELS) and mask_labels.shape == (B, MAX_NUM_LABELS)
    # tolerance dominated by bf16 MXU operands in the encoder matmuls (accumulation,
    # LayerNorm, softmax, residuals and the final classifier stay in f32)
    assert jnp.allclose(scores, ref_scores, atol=2e-3, rtol=2e-3), "scores mismatch"
    assert jnp.allclose(mask_labels, ref_mask), "mask mismatch"

    print("KERNEL_OK")
</pallas_src>

<mosaic_0001>
module attributes {stable_mosaic.version = 11 : i64} {
  func.func @cross_encoder_kernel(%arg0: i32, %arg1: memref<224x32xf32, #tpu.memory_space<vmem>>, %arg2: memref<96x384xbf16, #tpu.memory_space<vmem>>, %arg3: memref<16x128xf32, #tpu.memory_space<vmem>>, %arg4: memref<1x128xf32, #tpu.memory_space<vmem>>) attributes {dimension_semantics = [#tpu.dimension_semantics<arbitrary>], iteration_bounds = array<i64: 1>, scalar_prefetch = 0 : i64, scratch_operands = 0 : i64, tpu.core_type = #tpu.core_type<tc>, window_params = [{pipeline_mode = #tpu.pipeline_mode<synchronous>, transform_indices = @transform_0, window_bounds = array<i64: 224, 32>}, {pipeline_mode = #tpu.pipeline_mode<synchronous>, transform_indices = @transform_1, window_bounds = array<i64: 96, 384>}, {pipeline_mode = #tpu.pipeline_mode<synchronous>, transform_indices = @transform_2, window_bounds = array<i64: 16, 128>}, {pipeline_mode = #tpu.pipeline_mode<synchronous>, transform_indices = @transform_3, window_bounds = array<i64: 1, 128>}]} {
    %c0 = arith.constant 0 : index
    %c0_0 = arith.constant 0 : index
    %0 = vector.load %arg1[%c0, %c0_0] : memref<224x32xf32, #tpu.memory_space<vmem>>, vector<32x32xf32>
    %c32 = arith.constant 32 : index
    %c0_1 = arith.constant 0 : index
    %1 = vector.load %arg1[%c32, %c0_1] : memref<224x32xf32, #tpu.memory_space<vmem>>, vector<64x32xf32>
    %c96 = arith.constant 96 : index
    %c0_2 = arith.constant 0 : index
    %2 = vector.load %arg1[%c96, %c0_2] : memref<224x32xf32, #tpu.memory_space<vmem>>, vector<128x32xf32>
    %c0_3 = arith.constant 0 : index
    %c0_4 = arith.constant 0 : index
    %3 = vector.load %arg2[%c0_3, %c0_4] : memref<96x384xbf16, #tpu.memory_space<vmem>>, vector<32x96xbf16>
    %c0_5 = arith.constant 0 : index
    %c128 = arith.constant 128 : index
    %4 = vector.load %arg2[%c0_5, %c128] : memref<96x384xbf16, #tpu.memory_space<vmem>>, vector<32x64xbf16>
    %c0_6 = arith.constant 0 : index
    %c256 = arith.constant 256 : index
    %5 = vector.load %arg2[%c0_6, %c256] : memref<96x384xbf16, #tpu.memory_space<vmem>>, vector<32x32xbf16>
    %c32_7 = arith.constant 32 : index
    %c0_8 = arith.constant 0 : index
    %6 = vector.load %arg2[%c32_7, %c0_8] : memref<96x384xbf16, #tpu.memory_space<vmem>>, vector<64x32xbf16>
    %c0_9 = arith.constant 0 : index
    %c0_10 = arith.constant 0 : index
    %7 = vector.load %arg3[%c0_9, %c0_10] : memref<16x128xf32, #tpu.memory_space<vmem>>, vector<1x96xf32>
    %c1 = arith.constant 1 : index
    %c0_11 = arith.constant 0 : index
    %8 = vector.load %arg3[%c1, %c0_11] : memref<16x128xf32, #tpu.memory_space<vmem>>, vector<1x32xf32>
    %c2 = arith.constant 2 : index
    %c0_12 = arith.constant 0 : index
    %9 = vector.load %arg3[%c2, %c0_12] : memref<16x128xf32, #tpu.memory_space<vmem>>, vector<1x32xf32>
    %c3 = arith.constant 3 : index
    %c0_13 = arith.constant 0 : index
    %10 = vector.load %arg3[%c3, %c0_13] : memref<16x128xf32, #tpu.memory_space<vmem>>, vector<1x32xf32>
    %c4 = arith.constant 4 : index
    %c0_14 = arith.constant 0 : index
    %11 = vector.load %arg3[%c4, %c0_14] : memref<16x128xf32, #tpu.memory_space<vmem>>, vector<1x64xf32>
    %c5 = arith.constant 5 : index
    %c0_15 = arith.constant 0 : index
    %12 = vector.load %arg3[%c5, %c0_15] : memref<16x128xf32, #tpu.memory_space<vmem>>, vector<1x32xf32>
    %c6 = arith.constant 6 : index
    %c0_16 = arith.constant 0 : index
    %13 = vector.load %arg3[%c6, %c0_16] : memref<16x128xf32, #tpu.memory_space<vmem>>, vector<1x32xf32>
    %c7 = arith.constant 7 : index
    %c0_17 = arith.constant 0 : index
    %14 = vector.load %arg3[%c7, %c0_17] : memref<16x128xf32, #tpu.memory_space<vmem>>, vector<1x32xf32>
    %c8 = arith.constant 8 : index
    %c0_18 = arith.constant 0 : index
    %15 = vector.load %arg3[%c8, %c0_18] : memref<16x128xf32, #tpu.memory_space<vmem>>, vector<1x32xf32>
    %c9 = arith.constant 9 : index
    %c0_19 = arith.constant 0 : index
    %16 = vector.load %arg3[%c9, %c0_19] : memref<16x128xf32, #tpu.memory_space<vmem>>, vector<1x1xf32>
    %c10 = arith.constant 10 : index
    %c0_20 = arith.constant 0 : index
    %17 = vector.load %arg3[%c10, %c0_20] : memref<16x128xf32, #tpu.memory_space<vmem>>, vector<1x32xf32>
    %c11 = arith.constant 11 : index
    %c0_21 = arith.constant 0 : index
    %18 = vector.load %arg3[%c11, %c0_21] : memref<16x128xf32, #tpu.memory_space<vmem>>, vector<1x32xf32>
    %19 = arith.truncf %0 : vector<32x32xf32> to vector<32x32xbf16>
    %cst = arith.constant dense<0.000000e+00> : vector<32x96xf32>
    %20 = tpu.matmul %19, %3, %cst {dimension_numbers = #tpu.dot_dimension_numbers<[1], [0], [0], [1], [0, 0, 1, 1], [], []>} : vector<32x32xbf16>, vector<32x96xbf16>, vector<32x96xf32> -> vector<32x96xf32>
    %21 = vector.broadcast %7 : vector<1x96xf32> to vector<32x96xf32>
    %22 = arith.addf %20, %21 : vector<32x96xf32>
    %23 = vector.extract_strided_slice %22 {offsets = [0, 0], sizes = [32, 32], strides = [1, 1]} : vector<32x96xf32> to vector<32x32xf32>
    %24 = vector.extract_strided_slice %22 {offsets = [0, 32], sizes = [32, 32], strides = [1, 1]} : vector<32x96xf32> to vector<32x32xf32>
    %25 = vector.extract_strided_slice %22 {offsets = [0, 64], sizes = [32, 32], strides = [1, 1]} : vector<32x96xf32> to vector<32x32xf32>
    %26 = vector.broadcast %17 : vector<1x32xf32> to vector<32x32xf32>
    %27 = arith.mulf %23, %26 : vector<32x32xf32>
    %28 = vector.broadcast %18 : vector<1x32xf32> to vector<32x32xf32>
    %29 = arith.mulf %23, %28 : vector<32x32xf32>
    %30 = tpu.concatenate %27, %29 in 0 : vector<32x32xf32>, vector<32x32xf32> -> vector<64x32xf32>
    %31 = arith.truncf %30 : vector<64x32xf32> to vector<64x32xbf16>
    %32 = arith.truncf %24 : vector<32x32xf32> to vector<32x32xbf16>
    %cst_22 = arith.constant dense<0.000000e+00> : vector<64x32xf32>
    %33 = tpu.matmul %31, %32, %cst_22 {dimension_numbers = #tpu.dot_dimension_numbers<[1], [1], [0], [0], [0, 0, 1, 0], [], []>} : vector<64x32xbf16>, vector<32x32xbf16>, vector<64x32xf32> -> vector<64x32xf32>
    %cst_23 = arith.constant 2.500000e-01 : f32
    %34 = vector.broadcast %cst_23 : f32 to vector<64x32xf32>
    %35 = arith.mulf %33, %34 : vector<64x32xf32>
    %36 = arith.addf %35, %1 : vector<64x32xf32>
    %cst_24 = arith.constant dense<0xFF800000> : vector<64xf32>
    %37 = vector.multi_reduction <maximumf>, %36, %cst_24 [1] : vector<64x32xf32> to vector<64xf32>
    %38 = vector.shape_cast %37 : vector<64xf32> to vector<64x1xf32>
    %39 = vector.broadcast %38 : vector<64x1xf32> to vector<64x32xf32>
    %40 = arith.subf %36, %39 : vector<64x32xf32>
    %41 = math.exp %40 : vector<64x32xf32>
    %cst_25 = arith.constant dense<0.000000e+00> : vector<64xf32>
    %42 = vector.multi_reduction <add>, %41, %cst_25 [1] : vector<64x32xf32> to vector<64xf32>
    %43 = vector.shape_cast %42 : vector<64xf32> to vector<64x1xf32>
    %44 = vector.broadcast %43 : vector<64x1xf32> to vector<64x32xf32>
    %45 = arith.divf %41, %44 : vector<64x32xf32>
    %46 = arith.truncf %45 : vector<64x32xf32> to vector<64x32xbf16>
    %47 = arith.truncf %25 : vector<32x32xf32> to vector<32x32xbf16>
    %cst_26 = arith.constant dense<0.000000e+00> : vector<64x32xf32>
    %48 = tpu.matmul %46, %47, %cst_26 {dimension_numbers = #tpu.dot_dimension_numbers<[1], [0], [0], [1], [0, 0, 1, 1], [], []>} : vector<64x32xbf16>, vector<32x32xbf16>, vector<64x32xf32> -> vector<64x32xf32>
    %49 = vector.extract_strided_slice %48 {offsets = [0, 0], sizes = [32, 32], strides = [1, 1]} : vector<64x32xf32> to vector<32x32xf32>
    %50 = vector.broadcast %17 : vector<1x32xf32> to vector<32x32xf32>
    %51 = arith.mulf %49, %50 : vector<32x32xf32>
    %52 = vector.extract_strided_slice %48 {offsets = [32, 0], sizes = [32, 32], strides = [1, 1]} : vector<64x32xf32> to vector<32x32xf32>
    %53 = vector.broadcast %18 : vector<1x32xf32> to vector<32x32xf32>
    %54 = arith.mulf %52, %53 : vector<32x32xf32>
    %55 = arith.addf %51, %54 : vector<32x32xf32>
    %56 = arith.truncf %55 : vector<32x32xf32> to vector<32x32xbf16>
    %cst_27 = arith.constant dense<0.000000e+00> : vector<32x32xf32>
    %57 = tpu.matmul %56, %5, %cst_27 {dimension_numbers = #tpu.dot_dimension_numbers<[1], [0], [0], [1], [0, 0, 1, 1], [], []>} : vector<32x32xbf16>, vector<32x32xbf16>, vector<32x32xf32> -> vector<32x32xf32>
    %58 = vector.broadcast %8 : vector<1x32xf32> to vector<32x32xf32>
    %59 = arith.addf %57, %58 : vector<32x32xf32>
    %60 = arith.addf %0, %59 : vector<32x32xf32>
    %cst_28 = arith.constant dense<0.000000e+00> : vector<32xf32>
    %61 = vector.multi_reduction <add>, %60, %cst_28 [1] : vector<32x32xf32> to vector<32xf32>
    %62 = vector.shape_cast %61 : vector<32xf32> to vector<32x1xf32>
    %cst_29 = arith.constant 3.200000e+01 : f32
    %63 = vector.broadcast %cst_29 : f32 to vector<32x1xf32>
    %64 = arith.divf %62, %63 : vector<32x1xf32>
    %65 = arith.mulf %60, %60 : vector<32x32xf32>
    %cst_30 = arith.constant dense<0.000000e+00> : vector<32xf32>
    %66 = vector.multi_reduction <add>, %65, %cst_30 [1] : vector<32x32xf32> to vector<32xf32>
    %67 = vector.shape_cast %66 : vector<32xf32> to vector<32x1xf32>
    %cst_31 = arith.constant 3.200000e+01 : f32
    %68 = vector.broadcast %cst_31 : f32 to vector<32x1xf32>
    %69 = arith.divf %67, %68 : vector<32x1xf32>
    %70 = arith.mulf %64, %64 : vector<32x1xf32>
    %71 = arith.subf %69, %70 : vector<32x1xf32>
    %72 = vector.broadcast %64 : vector<32x1xf32> to vector<32x32xf32>
    %73 = arith.subf %60, %72 : vector<32x32xf32>
    %cst_32 = arith.constant 9.99999996E-13 : f32
    %74 = vector.broadcast %cst_32 : f32 to vector<32x1xf32>
    %75 = arith.addf %71, %74 : vector<32x1xf32>
    %76 = math.rsqrt %75 : vector<32x1xf32>
    %77 = vector.broadcast %76 : vector<32x1xf32> to vector<32x32xf32>
    %78 = arith.mulf %73, %77 : vector<32x32xf32>
    %79 = vector.broadcast %9 : vector<1x32xf32> to vector<32x32xf32>
    %80 = arith.mulf %78, %79 : vector<32x32xf32>
    %81 = vector.broadcast %10 : vector<1x32xf32> to vector<32x32xf32>
    %82 = arith.addf %80, %81 : vector<32x32xf32>
    %83 = arith.truncf %82 : vector<32x32xf32> to vector<32x32xbf16>
    %cst_33 = arith.constant dense<0.000000e+00> : vector<32x64xf32>
    %84 = tpu.matmul %83, %4, %cst_33 {dimension_numbers = #tpu.dot_dimension_numbers<[1], [0], [0], [1], [0, 0, 1, 1], [], []>} : vector<32x32xbf16>, vector<32x64xbf16>, vector<32x64xf32> -> vector<32x64xf32>
    %85 = vector.broadcast %11 : vector<1x64xf32> to vector<32x64xf32>
    %86 = arith.addf %84, %85 : vector<32x64xf32>
    %cst_34 = arith.constant 5.000000e-01 : f32
    %87 = vector.broadcast %cst_34 : f32 to vector<32x64xf32>
    %88 = arith.mulf %87, %86 : vector<32x64xf32>
    %cst_35 = arith.constant 4.471500e-02 : f32
    %89 = vector.broadcast %cst_35 : f32 to vector<32x64xf32>
    %90 = arith.mulf %89, %86 : vector<32x64xf32>
    %91 = arith.mulf %90, %86 : vector<32x64xf32>
    %92 = arith.mulf %91, %86 : vector<32x64xf32>
    %93 = arith.addf %86, %92 : vector<32x64xf32>
    %cst_36 = arith.constant 0.797884583 : f32
    %94 = vector.broadcast %cst_36 : f32 to vector<32x64xf32>
    %95 = arith.mulf %94, %93 : vector<32x64xf32>
    %96 = math.tanh %95 : vector<32x64xf32>
    %cst_37 = arith.constant 1.000000e+00 : f32
    %97 = vector.broadcast %cst_37 : f32 to vector<32x64xf32>
    %98 = arith.addf %97, %96 : vector<32x64xf32>
    %99 = arith.mulf %88, %98 : vector<32x64xf32>
    %100 = arith.truncf %99 : vector<32x64xf32> to vector<32x64xbf16>
    %cst_38 = arith.constant dense<0.000000e+00> : vector<32x32xf32>
    %101 = tpu.matmul %100, %6, %cst_38 {dimension_numbers = #tpu.dot_dimension_numbers<[1], [0], [0], [1], [0, 0, 1, 1], [], []>} : vector<32x64xbf16>, vector<64x32xbf16>, vector<32x32xf32> -> vector<32x32xf32>
    %102 = vector.broadcast %12 : vector<1x32xf32> to vector<32x32xf32>
    %103 = arith.addf %101, %102 : vector<32x32xf32>
    %104 = arith.addf %82, %103 : vector<32x32xf32>
    %cst_39 = arith.constant dense<0.000000e+00> : vector<32xf32>
    %105 = vector.multi_reduction <add>, %104, %cst_39 [1] : vector<32x32xf32> to vector<32xf32>
    %106 = vector.shape_cast %105 : vector<32xf32> to vector<32x1xf32>
    %cst_40 = arith.constant 3.200000e+01 : f32
    %107 = vector.broadcast %cst_40 : f32 to vector<32x1xf32>
    %108 = arith.divf %106, %107 : vector<32x1xf32>
    %109 = arith.mulf %104, %104 : vector<32x32xf32>
    %cst_41 = arith.constant dense<0.000000e+00> : vector<32xf32>
    %110 = vector.multi_reduction <add>, %109, %cst_41 [1] : vector<32x32xf32> to vector<32xf32>
    %111 = vector.shape_cast %110 : vector<32xf32> to vector<32x1xf32>
    %cst_42 = arith.constant 3.200000e+01 : f32
    %112 = vector.broadcast %cst_42 : f32 to vector<32x1xf32>
    %113 = arith.divf %111, %112 : vector<32x1xf32>
    %114 = arith.mulf %108, %108 : vector<32x1xf32>
    %115 = arith.subf %113, %114 : vector<32x1xf32>
    %116 = vector.broadcast %108 : vector<32x1xf32> to vector<32x32xf32>
    %117 = arith.subf %104, %116 : vector<32x32xf32>
    %cst_43 = arith.constant 9.99999996E-13 : f32
    %118 = vector.broadcast %cst_43 : f32 to vector<32x1xf32>
    %119 = arith.addf %115, %118 : vector<32x1xf32>
    %120 = math.rsqrt %119 : vector<32x1xf32>
    %121 = vector.broadcast %120 : vector<32x1xf32> to vector<32x32xf32>
    %122 = arith.mulf %117, %121 : vector<32x32xf32>
    %123 = vector.broadcast %13 : vector<1x32xf32> to vector<32x32xf32>
    %124 = arith.mulf %122, %123 : vector<32x32xf32>
    %125 = vector.broadcast %14 : vector<1x32xf32> to vector<32x32xf32>
    %126 = arith.addf %124, %125 : vector<32x32xf32>
    %cst_44 = arith.constant dense<0.000000e+00> : vector<128x32xf32>
    %127 = tpu.matmul %2, %126, %cst_44 {dimension_numbers = #tpu.dot_dimension_numbers<[1], [0], [0], [1], [0, 0, 1, 1], [], []>} : vector<128x32xf32>, vector<32x32xf32>, vector<128x32xf32> -> vector<128x32xf32>
    %cst_45 = arith.constant dense<0.000000e+00> : vector<1x128xf32>
    %128 = tpu.matmul %15, %127, %cst_45 {dimension_numbers = #tpu.dot_dimension_numbers<[1], [1], [0], [0], [0, 0, 1, 0], [], []>} : vector<1x32xf32>, vector<128x32xf32>, vector<1x128xf32> -> vector<1x128xf32>
    %129 = vector.broadcast %16 : vector<1x1xf32> to vector<1x128xf32>
    %130 = arith.addf %128, %129 : vector<1x128xf32>
    %c0_46 = arith.constant 0 : index
    %c0_47 = arith.constant 0 : index
    %131 = vector.load %arg4[%c0_46, %c0_47] : memref<1x128xf32, #tpu.memory_space<vmem>>, vector<1x128xf32>
    tpu.vector_store %arg4[%c0_46, %c0_47], %130 {strides = array<i32>} : memref<1x128xf32, #tpu.memory_space<vmem>>, vector<1x128xf32>,
    return
  }
  func.func @transform_0(%arg0: i32) -> (i32, i32) {
    %c0_i32 = arith.constant 0 : i32
    %c0_i32_0 = arith.constant 0 : i32
    %c0_i32_1 = arith.constant 0 : i32
    return %c0_i32, %c0_i32_0 : i32, i32
  }
  func.func @transform_1(%arg0: i32) -> (i32, i32) {
    %c0_i32 = arith.constant 0 : i32
    %c0_i32_0 = arith.constant 0 : i32
    %c0_i32_1 = arith.constant 0 : i32
    return %c0_i32, %c0_i32_0 : i32, i32
  }
  func.func @transform_2(%arg0: i32) -> (i32, i32) {
    %c0_i32 = arith.constant 0 : i32
    %c0_i32_0 = arith.constant 0 : i32
    %c0_i32_1 = arith.constant 0 : i32
    return %c0_i32, %c0_i32_0 : i32, i32
  }
  func.func @transform_3(%arg0: i32) -> (i32, i32) {
    %c0_i32 = arith.constant 0 : i32
    %c0_i32_0 = arith.constant 0 : i32
    %c0_i32_1 = arith.constant 0 : i32
    return %c0_i32, %c0_i32_0 : i32, i32
  }
}

</mosaic_0001>

<bundles_post_ra>
// kernel: squeeze.1
= control target key start
LH: loop header
LB: loop body
LE: loop exit
PB: predicated region body
PF: predicated region fallthrough
CT: control target
= control target key end

     0   :  { %s85_s0 = inlined_call_operand.vmem [shape: f32[8], index: 0, kind: input, shape index: {}]   ;;  %s86_s1 = inlined_call_operand.hbm [shape: f32[2,4], index: 1, kind: output, shape index: {}]  }
   0x1   :  { %v5_v0 = vld [vmem:[%s85_s0] sm:$0x1] }
   0x2   :  { %2 = vsyncpa [#allocation1], 0  ;;  %6 = vst [vmem:[#allocation3] sm:$0x1] %v5_v0  ;;  %vm8_vm0 = vcmask 31744   ;;  %s58_s0 = smov 124  }
   0x3   :  { %s59_s8 = smov [#allocation0]  }
   0x4   :  { %s26_s9 = sshll.u32 %s59_s8, 4  ;;  %s27_s9 = int_to_ptr.vmem [resolvable:$true] %s26_s9 }
   0x5   :  { %s34_s10 = scalar_lea.vmem %s27_s9, 32  ;;  %p39_p1 = scmp.lt.s32.totalorder %s27_s9, %s27_s9 }
   0x6   :  { %p35_p0 = scmp.ne.s32.totalorder %s27_s9, %s34_s10  ;;  %p40_p2 = scmp.lt.s32.totalorder %s34_s10, %s34_s10 }
   0x8   :  { %p41_p3 = por %p40_p2, %p39_p1 }
   0x9   :  { %v10_v1 = vld [vmem:[#allocation3] sm:$0x1]  }
   0xa   :  { %v7_v2 = vld [vmem:[#allocation3] sm:$0x1]   ;;  %11 = vrot.lane.b32.xlu0 %v10_v1, %s58_s0  ;;  %p42_p4 = pnand %p41_p3, %p35_p0 }
   0xb   :  { %9 = vst.msk [vmem:[#allocation2] sm:$0x1] %vm8_vm0, %v7_v2  }
  0x7c   :  { %v12_v3 = vpop.permute.xlu0 %11  }
  0x7d   :  { %15 = vst.msk [vmem:[#allocation2 + $0x1] sm:$0x1] %vm8_vm0, %v12_v3  }
  0x84   :  { %v19_v4 = vld [vmem:[#allocation2] sm:$0x3] }
  0x85   :  { %21 = vst [vmem:[#allocation0] sm:$0x3] %v19_v4 }
  0x86   :  { %45 = shalt.err (!%p42_p4)
}
  0x87   :  { %s46_s13 = scalar_lea.hbm %s86_s1, 32 }
  0x88   :  { %p47_p5 = scmp.ne.s32.totalorder %s86_s1, %s46_s13  ;;  %p50_p6 = scmp.lt.u32.totalorder %s46_s13, %s86_s1 }
  0x8a   :  { %p52_p7 = pnand %p50_p6, %p47_p5 }
  0x8c   :  { %55 = shalt.err (!%p52_p7)
}
  0x8d   :  { %29 = dma.vmem_to_hbm [thread:$0]  %s27_s9, 32, %s86_s1, [#allocation1]  }
  0x8e   :  { %56 = dma.done.wait [#allocation1], 32  }
  0x8f   :  { %57 = vsyncadd [#allocation1], 4294967264 }
  0x90   :  { %31 = vsyncpa [#allocation1], 1 }

// kernel: forward.1
= control target key start
LH: loop header
LB: loop body
LE: loop exit
PB: predicated region body
PF: predicated region fallthrough
CT: control target
= control target key end

     0   :  { %vm93_vm0 = vcmask 261120   ;;  %s1595_s30 = smov 96   ;;  %s1596_s20 = smov 64   ;;  %vm756_vm1 = vcmask 523264   ;;  %vm1598_vm2 = vmmov 0   ;;  %s1963_s1 = inlined_call_operand.vmem [shape: bf16[96,384], index: 1, kind: input, shape index: {}]   ;;  %s1964_s0 = inlined_call_operand.vmem [shape: f32[224,32], index: 0, kind: input, shape index: {}]   ;;  %s1965_s2 = inlined_call_operand.vmem [shape: f32[16,128], index: 2, kind: input, shape index: {}]   ;;  %s1966_s3 = inlined_call_operand.vmem [shape: f32[1,128], index: 3, kind: output, shape index: {}]  }
   0x1   :  { %v1529_v0 = vld [vmem:[%s1963_s1] ss:$12 sps:$4 sm:$0xff]   ;;  %v1530_v1 = vld [vmem:[%s1963_s1 + $0x18] ss:$12 sps:$4 sm:$0xff]   ;;  %v1642_v5 = vld [vmem:[%s1964_s0 + $0x10] sm:$0xff] }
   0x2   :  { %1352 = vmatprep.subr.bf16.mxu0 %v1529_v0  ;;  %v1630_v2 = vld [vmem:[%s1964_s0] sm:$0xff]  ;;  %v1635_v3 = vld [vmem:[%s1964_s0 + $0x8] sm:$0xff]  ;;  %v1647_v6 = vld [vmem:[%s1964_s0 + $0x18] sm:$0xff] }
   0x3   :  { %1353 = vmatpush3.bf16.msra.mxu0 %v1529_v0  ;;  %v75_v4 = vpack.c.bf16 %v1635_v3, %v1630_v2  ;;  %v76_v7 = vpack.c.bf16 %v1647_v6, %v1642_v5  ;;  %v1216_v8 = vld [vmem:[%s1965_s2] ss:$0 sm:$0xff]  ;;  %v1659_v10 = vld [vmem:[%s1965_s2 + $0xa] ss:$0 sm:$0xff]  ;;  %v1664_v11 = vld [vmem:[%s1965_s2 + $0xb] ss:$0 sm:$0xff] }
   0x4   :  { %1354 = vmatprep.subr.bf16.mxu0 %v1530_v1  ;;  %v21_v38 = vld [vmem:[%s1964_s0 + $0x30] sm:$0xff]  ;;  %v19_v41 = vld [vmem:[%s1964_s0 + $0x20] sm:$0xff]  ;;  %v22_v47 = vld [vmem:[%s1964_s0 + $0x38] sm:$0xff] }
   0x5   :  { %1356 = vmatprep.mubr.msk.bf16.mxu0 %vm93_vm0, %v75_v4  ;;  %v20_v53 = vld [vmem:[%s1964_s0 + $0x28] sm:$0xff]  ;;  %v25_v61 = vld [vmem:[%s1964_s0 + $0x50] sm:$0xff]  ;;  %vm1936_vm3 = vmpackc.low %vm93_vm0, %vm93_vm0 }
   0x7   :  { %1355 = vmatpush3.bf16.msra.mxu0 %v1530_v1  ;;  %v23_v1 = vld [vmem:[%s1964_s0 + $0x40] sm:$0xff] }
   0xa   :  { %1357 = vmatmul.mubr.msk.bf16.vlgmr.msra.gmra.mrb[0].mxu0 %vm93_vm0, %v76_v7 }
  0xdd   :  { %v1358_v9 = vpop.f32.mrb[0].mxu0 }
  0xde   :  { %v143_v12 = vadd.f32 %v1358_v9, %v1216_v8  ;;  %v134_v13 = vpop.f32.mrb[1].mxu0  ;;  %v24_v9 = vld [vmem:[%s1964_s0 + $0x48] sm:$0xff] }
  0xdf   :  { %v135_v14 = vadd.f32 %v1216_v8, %v134_v13  ;;  %v1359_v15 = vpop.f32.mrb[2].mxu0 }
  0xe0   :  { %v146_v16 = vadd.f32 %v1359_v15, %v1216_v8  ;;  %v137_v17 = vpop.f32.mrb[3].mxu0  ;;  %v155_v18 = vmul.f32 %v1659_v10, %v143_v12  ;;  %v163_v19 = vmul.f32 %v1664_v11, %v143_v12  ;;  %v26_v15 = vld [vmem:[%s1964_s0 + $0x58] sm:$0xff] }
  0xe1   :  { %v138_v20 = vadd.f32 %v1216_v8, %v137_v17  ;;  %v153_v21 = vmul.f32 %v1659_v10, %v135_v14  ;;  %v161_v25 = vmul.f32 %v1664_v11, %v135_v14 }
  0xe2   :  { %v156_v22 = vmul.f32 %v1659_v10, %v146_v16  ;;  %v164_v23 = vmul.f32 %v1664_v11, %v146_v16  ;;  %v1671_v24 = vpack.c.bf16 %v146_v16, %v143_v12 }
  0xe3   :  { %v154_v26 = vmul.f32 %v1659_v10, %v138_v20  ;;  %v162_v27 = vmul.f32 %v1664_v11, %v138_v20  ;;  %v1676_v28 = vpack.c.bf16 %v138_v20, %v135_v14 }
  0xe4   :  { %v166_v29 = vpack.c.bf16 %v156_v22, %v155_v18  ;;  %v168_v30 = vpack.c.bf16 %v164_v23, %v163_v19 }
  0xe5   :  { %v165_v31 = vpack.c.bf16 %v154_v26, %v153_v21  ;;  %v167_v32 = vpack.c.bf16 %v162_v27, %v161_v25  ;;  %173 = vrot.lane.b32.xlu0 %v1676_v28, %s1595_s30 }
  0xe7   :  { %1364 = vmatprep.mubr.msk.bf16.mxu0 %vm93_vm0, %v165_v31 }
  0xe9   :  { %175 = vrot.lane.b32.xlu0 %v1671_v24, %s1595_s30 }
 0x157   :  { %v174_v33 = vpop.permute.xlu0 %173 }
 0x158   :  { %v190_v34 = vsel %vm93_vm0, %v174_v33, 0  ;;  %1519 = vmatprep.subr.msk.bf16.mxu0 %vm93_vm0, %v174_v33 }
 0x159   :  { %1361 = vmatpush3.bf16.xpose.msra.mxu0 %v190_v34 }
 0x15b   :  { %v176_v35 = vpop.permute.xlu0 %175 }
 0x15c   :  { %1520 = vmatprep.subr.msk.bf16.mxu0 %vm93_vm0, %v176_v35  ;;  %v193_v36 = vsel %vm93_vm0, %v176_v35, 0 }
 0x161   :  { %1363 = vmatpush3.bf16.xpose.msra.mxu0 %v193_v36 }
 0x168   :  { %1365 = vmatmul.mubr.msk.bf16.vlgmr.msra.gmra.mrb[4].mxu0 %vm93_vm0, %v166_v29 }
 0x169   :  { %1368 = vmatprep.mubr.msk.bf16.mxu0 %vm93_vm0, %v167_v32 }
 0x170   :  { %1369 = vmatmul.mubr.msk.bf16.gmra.mrb[8].mxu0 %vm93_vm0, %v168_v30 }
 0x23b   :  { %v1366_v37 = vpop.f32.mrb[4].mxu0 }
 0x23c   :  { %v262_v39 = vmul.f32 0.25, %v1366_v37  ;;  %v229_v40 = vpop.f32.mrb[5].mxu0 }
 0x23d   :  { %v260_v42 = vmul.f32 0.25, %v229_v40  ;;  %v1367_v43 = vpop.f32.mrb[6].mxu0 }
 0x23e   :  { %v263_v44 = vmul.f32 0.25, %v1367_v43  ;;  %v232_v45 = vpop.f32.mrb[7].mxu0  ;;  %v270_v46 = vadd.f32 %v262_v39, %v21_v38 }
 0x23f   :  { %v268_v48 = vadd.f32 %v260_v42, %v19_v41  ;;  %v261_v50 = vmul.f32 0.25, %v232_v45 }
 0x240   :  { %v282_v49 = vsel %vm93_vm0, %v270_v46, -inf  ;;  %v271_v52 = vadd.f32 %v263_v44, %v22_v47 }
 0x241   :  { %283 = vmax.xlane.f32.xlu0 %v282_v49  ;;  %v276_v51 = vsel %vm93_vm0, %v268_v48, -inf  ;;  %v269_v59 = vadd.f32 %v261_v50, %v20_v53 }
 0x242   :  { %277 = vmax.xlane.f32.xlu1 %v276_v51  ;;  %v285_v58 = vsel %vm93_vm0, %v271_v52, -inf }
 0x243   :  { %v1370_v54 = vpop.f32.mrb[8].mxu0  ;;  %v279_v63 = vsel %vm93_vm0, %v269_v59, -inf }
 0x244   :  { %v245_v55 = vpop.f32.mrb[9].mxu0  ;;  %v266_v56 = vmul.f32 0.25, %v1370_v54 }
 0x245   :  { %v1371_v57 = vpop.f32.mrb[10].mxu0  ;;  %v264_v62 = vmul.f32 0.25, %v245_v55 }
 0x246   :  { %286 = vmax.xlane.f32.xlu1 %v285_v58  ;;  %v248_v60 = vpop.f32.mrb[11].mxu0  ;;  %v274_v0 = vadd.f32 %v266_v56, %v25_v61  ;;  %v267_v12 = vmul.f32 0.25, %v1371_v57 }
 0x247   :  { %v265_v4 = vmul.f32 0.25, %v248_v60  ;;  %v272_v8 = vadd.f32 %v264_v62, %v23_v1 }
 0x248   :  { %v294_v7 = vsel %vm93_vm0, %v274_v0, -inf  ;;  %v275_v17 = vadd.f32 %v267_v12, %v26_v15 }
 0x249   :  { %v288_v13 = vsel %vm93_vm0, %v272_v8, -inf  ;;  %v273_v14 = vadd.f32 %v265_v4, %v24_v9 }
 0x24a   :  { %280 = vmax.xlane.f32.xlu1 %v279_v63  ;;  %v297_v18 = vsel %vm93_vm0, %v275_v17, -inf }
 0x24b   :  { %v291_v16 = vsel %vm93_vm0, %v273_v14, -inf }
 0x24e   :  { %295 = vmax.xlane.f32.xlu1 %v294_v7 }
 0x252   :  { %289 = vmax.xlane.f32.xlu1 %v288_v13 }
 0x256   :  { %292 = vmax.xlane.f32.xlu1 %v291_v16 }
 0x25a   :  { %298 = vmax.xlane.f32.xlu1 %v297_v18 }
 0x2ce   :  { %v284_v19 = vpop.xlane.xlu0 %283 }
 0x2cf   :  { %v302_v20 = vsub.f32 %v270_v46, %v284_v19  ;;  %v278_v21 = vpop.xlane.xlu1 %277 }
 0x2d0   :  { %v300_v22 = vsub.f32 %v268_v48, %v278_v21 }
 0x2d1   :  { %v312_v23 = vmul.f32 1.442695, %v302_v20 }
 0x2d2   :  { %v308_v25 = vmul.f32 1.442695, %v300_v22 }
 0x2d3   :  { %1539 = vpow2.f32 %v312_v23  ;;  %v287_v26 = vpop.xlane.xlu1 %286 }
 0x2d4   :  { %v303_v27 = vsub.f32 %v271_v52, %v287_v26  ;;  %1541 = vpow2.f32 %v308_v25 }
 0x2d6   :  { %v314_v29 = vmul.f32 1.442695, %v303_v27 }
 0x2d7   :  { %v281_v30 = vpop.xlane.xlu1 %280 }
 0x2d8   :  { %1543 = vpow2.f32 %v314_v29  ;;  %v301_v31 = vsub.f32 %v269_v59, %v281_v30 }
 0x2da   :  { %v310_v32 = vmul.f32 1.442695, %v301_v31 }
 0x2db   :  { %v296_v33 = vpop.xlane.xlu1 %295 }
 0x2dc   :  { %1545 = vpow2.f32 %v310_v32  ;;  %v306_v34 = vsub.f32 %v274_v0, %v296_v33  ;;  %v1531_v33 = vld [vmem:[%s1963_s1 + $0x8] ss:$12 sps:$4 sm:$0xff]  }
 0x2dd   :  { %v1720_v35 = vpop.eup %1539 }
 0x2de   :  { %v320_v36 = vmul.f32 1.442695, %v306_v34  ;;  %v330_v37 = vsel %vm93_vm0, %v1720_v35, 0.0  ;;  %v1542_v38 = vpop.eup %1541  ;;  %v1532_v34 = vld [vmem:[%s1963_s1 + $0x20] ss:$12 sps:$4 sm:$0xff]  }
 0x2df   :  { %v290_v39 = vpop.xlane.xlu1 %289  ;;  %331 = vadd.xlane.f32.xlu1 %v330_v37  ;;  %v324_v43 = vsel %vm93_vm0, %v1542_v38, 0.0 }
 0x2e0   :  { %1547 = vpow2.f32 %v320_v36  ;;  %v304_v40 = vsub.f32 %v272_v8, %v290_v39 }
 0x2e2   :  { %v1544_v41 = vpop.eup %1543  ;;  %v316_v42 = vmul.f32 1.442695, %v304_v40 }
 0x2e3   :  { %325 = vadd.xlane.f32.xlu1 %v324_v43  ;;  %v293_v44 = vpop.xlane.xlu1 %292  ;;  %v333_v45 = vsel %vm93_vm0, %v1544_v41, 0.0 }
 0x2e4   :  { %1549 = vpow2.f32 %v316_v42  ;;  %334 = vadd.xlane.f32.xlu0 %v333_v45  ;;  %v305_v47 = vsub.f32 %v273_v14, %v293_v44 }
 0x2e6   :  { %v1546_v46 = vpop.eup %1545  ;;  %v318_v52 = vmul.f32 1.442695, %v305_v47 }
 0x2e7   :  { %v299_v48 = vpop.xlane.xlu1 %298  ;;  %v327_v49 = vsel %vm93_vm0, %v1546_v46, 0.0 }
 0x2e8   :  { %v307_v50 = vsub.f32 %v275_v17, %v299_v48  ;;  %328 = vadd.xlane.f32.xlu1 %v327_v49 }
 0x2ea   :  { %v1548_v51 = vpop.eup %1547  ;;  %v322_v53 = vmul.f32 1.442695, %v307_v50 }
 0x2eb   :  { %v342_v54 = vsel %vm93_vm0, %v1548_v51, 0.0 }
 0x2ec   :  { %1551 = vpow2.f32 %v322_v53  ;;  %343 = vadd.xlane.f32.xlu1 %v342_v54 }
 0x2ed   :  { %1553 = vpow2.f32 %v318_v52 }
 0x2ee   :  { %v1550_v55 = vpop.eup %1549 }
 0x2ef   :  { %v336_v56 = vsel %vm93_vm0, %v1550_v55, 0.0 }
 0x2f0   :  { %337 = vadd.xlane.f32.xlu1 %v336_v56 }
 0x2f6   :  { %v1552_v57 = vpop.eup %1551 }
 0x2f7   :  { %v345_v58 = vsel %vm93_vm0, %v1552_v57, 0.0  ;;  %v1554_v59 = vpop.eup %1553 }
 0x2f8   :  { %346 = vadd.xlane.f32.xlu0 %v345_v58  ;;  %v339_v60 = vsel %vm93_vm0, %v1554_v59, 0.0 }
 0x2fc   :  { %340 = vadd.xlane.f32.xlu0 %v339_v60 }
 0x301   :  { %368 = vrot.lane.b32.xlu1 %v1676_v28, %s1596_s20 }
 0x312   :  { %370 = vrot.lane.b32.xlu0 %v1671_v24, %s1596_s20 }
 0x36c   :  { %v332_v61 = vpop.xlane.xlu1 %331 }
 0x370   :  { %v326_v62 = vpop.xlane.xlu1 %325 }
 0x371   :  { %1555 = vrcp.f32 %v326_v62  ;;  %v335_v1 = vpop.xlane.xlu0 %334 }
 0x375   :  { %v329_v63 = vpop.xlane.xlu1 %328 }
 0x376   :  { %1557 = vrcp.f32 %v329_v63 }
 0x377   :  { %1559 = vrcp.f32 %v335_v1 }
 0x378   :  { %1561 = vrcp.f32 %v332_v61 }
 0x379   :  { %v344_v0 = vpop.xlane.xlu1 %343 }
 0x37b   :  { %v1556_v7 = vpop.eup %1555 }
 0x37c   :  { %v349_v12 = vmul.f32 %v1556_v7, %v1542_v38 }
 0x37d   :  { %v338_v4 = vpop.xlane.xlu1 %337 }
 0x380   :  { %v1558_v8 = vpop.eup %1557 }
 0x381   :  { %v369_v9 = vpop.permute.xlu1 %368  ;;  %v351_v13 = vmul.f32 %v1558_v8, %v1546_v46  ;;  %v1560_v24 = vpop.eup %1559 }
 0x382   :  { %1372 = vmatprep.subr.bf16.mxu0 %v369_v9  ;;  %v1562_v16 = vpop.eup %1561  ;;  %v355_v17 = vmul.f32 %v1560_v24, %v1544_v41 }
 0x383   :  { %1373 = vmatpush3.bf16.msra.mxu0 %v369_v9  ;;  %v364_v28 = vpack.c.bf16 %v351_v13, %v349_v12  ;;  %v353_v19 = vmul.f32 %v1562_v16, %v1720_v35  ;;  %v1533_v16 = vld [vmem:[%s1963_s1 + $0x4] ss:$12 sps:$4 sm:$0xff]  }
 0x384   :  { %1392 = vmatprep.subr.bf16.mxu1 %v1533_v16 }
 0x385   :  { %v347_v14 = vpop.xlane.xlu0 %346  ;;  %1376 = vmatprep.mubr.msk.bf16.mxu0 %vm93_vm0, %v364_v28  ;;  %v365_v20 = vpack.c.bf16 %v355_v17, %v353_v19  ;;  %v1534_v17 = vld [vmem:[%s1963_s1 + $0x1c] ss:$12 sps:$4 sm:$0xff]   ;;  %1393 = vmatpush3.bf16.msra.mxu1 %v1533_v16 }
 0x386   :  { %1563 = vrcp.f32 %v347_v14  ;;  %1394 = vmatprep.subr.bf16.mxu1 %v1534_v17 }
 0x387   :  { %1565 = vrcp.f32 %v338_v4 }
 0x388   :  { %1567 = vrcp.f32 %v344_v0 }
 0x389   :  { %v341_v15 = vpop.xlane.xlu0 %340  ;;  %1395 = vmatpush3.bf16.msra.mxu1 %v1534_v17 }
 0x38a   :  { %1569 = vrcp.f32 %v341_v15 }
 0x38d   :  { %v371_v18 = vpop.permute.xlu0 %370 }
 0x38e   :  { %1374 = vmatprep.subr.bf16.mxu0 %v371_v18 }
 0x38f   :  { %1375 = vmatpush3.bf16.msra.mxu0 %v371_v18 }
 0x390   :  { %v1564_v21 = vpop.eup %1563  ;;  %1384 = vmatprep.subr.bf16.mxu0 %v1531_v33 }
 0x391   :  { %v1566_v22 = vpop.eup %1565  ;;  %v363_v26 = vmul.f32 %v1564_v21, %v1552_v57  ;;  %v1231_v57 = vld [vmem:[%s1965_s2 + $0x1] ss:$0 sm:$0xff] }
 0x392   :  { %1377 = vmatmul.mubr.msk.bf16.vlgmr.msra.gmra.mrb[12].mxu0 %vm93_vm0, %v365_v20  ;;  %v1568_v23 = vpop.eup %1567  ;;  %v357_v27 = vmul.f32 %v1566_v22, %v1550_v55 }
 0x393   :  { %v361_v30 = vmul.f32 %v1568_v23, %v1548_v51  ;;  %1385 = vmatpush3.bf16.msra.mxu0 %v1531_v33 }
 0x394   :  { %v1570_v25 = vpop.eup %1569  ;;  %1386 = vmatprep.subr.bf16.mxu0 %v1532_v34 }
 0x395   :  { %v359_v29 = vmul.f32 %v1570_v25, %v1554_v59  ;;  %v367_v32 = vpack.c.bf16 %v363_v26, %v361_v30 }
 0x397   :  { %v366_v31 = vpack.c.bf16 %v359_v29, %v357_v27  ;;  %1387 = vmatpush3.bf16.msra.mxu0 %v1532_v34 }
 0x399   :  { %1380 = vmatprep.mubr.msk.bf16.mxu0 %vm93_vm0, %v366_v31 }
 0x39a   :  { %1381 = vmatmul.mubr.msk.bf16.gmra.mrb[16].mxu0 %vm93_vm0, %v367_v32 }
 0x465   :  { %v1378_v35 = vpop.f32.mrb[12].mxu0 }
 0x466   :  { %v420_v36 = vpop.f32.mrb[13].mxu0  ;;  %v453_v40 = vmul.f32 %v1378_v35, %v1659_v10 }
 0x467   :  { %v1379_v37 = vpop.f32.mrb[14].mxu0  ;;  %v451_v43 = vmul.f32 %v1659_v10, %v420_v36 }
 0x468   :  { %v423_v38 = vpop.f32.mrb[15].mxu0  ;;  %v454_v46 = vmul.f32 %v1379_v37, %v1659_v10 }
 0x469   :  { %v452_v50 = vmul.f32 %v1659_v10, %v423_v38 }
 0x46d   :  { %v1382_v39 = vpop.f32.mrb[16].mxu0 }
 0x46e   :  { %v457_v41 = vmul.f32 %v1382_v39, %v1664_v11  ;;  %v436_v42 = vpop.f32.mrb[17].mxu0 }
 0x46f   :  { %v455_v44 = vmul.f32 %v1664_v11, %v436_v42  ;;  %v1383_v45 = vpop.f32.mrb[18].mxu0 }
 0x470   :  { %v461_v47 = vadd.f32 %v457_v41, %v453_v40  ;;  %v458_v48 = vmul.f32 %v1383_v45, %v1664_v11  ;;  %v439_v49 = vpop.f32.mrb[19].mxu0 }
 0x471   :  { %v459_v51 = vadd.f32 %v455_v44, %v451_v43  ;;  %v456_v52 = vmul.f32 %v1664_v11, %v439_v49 }
 0x472   :  { %v462_v53 = vadd.f32 %v458_v48, %v454_v46 }
 0x473   :  { %v460_v54 = vadd.f32 %v456_v52, %v452_v50  ;;  %v1236_v50 = vld [vmem:[%s1965_s2 + $0x2] ss:$0 sm:$0xff] }
 0x474   :  { %v464_v55 = vpack.c.bf16 %v462_v53, %v461_v47 }
 0x475   :  { %v463_v56 = vpack.c.bf16 %v460_v54, %v459_v51 }
 0x477   :  { %1388 = vmatprep.mubr.msk.bf16.mxu0 %vm93_vm0, %v463_v56 }
 0x478   :  { %1389 = vmatmul.mubr.msk.bf16.vlgmr.msra.gmra.mrb[20].mxu0 %vm93_vm0, %v464_v55 }
 0x54b   :  { %v1390_v58 = vpop.f32.mrb[20].mxu0 }
 0x54c   :  { %v530_v59 = vadd.f32 %v1390_v58, %v1231_v57  ;;  %v521_v60 = vpop.f32.mrb[21].mxu0  ;;  %v1237_v58 = vld [vmem:[%s1965_s2 + $0x3] ss:$0 sm:$0xff] }
 0x54d   :  { %v522_v61 = vadd.f32 %v1231_v57, %v521_v60  ;;  %v1391_v10 = vpop.f32.mrb[22].mxu0 }
 0x54e   :  { %v1758_v62 = vadd.f32 %v530_v59, %v1642_v5  ;;  %v533_v11 = vadd.f32 %v1391_v10, %v1231_v57  ;;  %v524_v63 = vpop.f32.mrb[23].mxu0 }
 0x54f   :  { %v525_v0 = vadd.f32 %v1231_v57, %v524_v63  ;;  %v1761_v1 = vadd.f32 %v522_v61, %v1630_v2 }
 0x550   :  { %v1764_v4 = vadd.f32 %v533_v11, %v1647_v6  ;;  %v546_v7 = vsel %vm93_vm0, %v1758_v62, 0.0  ;;  %v559_v13 = vmul.f32 %v1758_v62, %v1758_v62 }
 0x551   :  { %547 = vadd.xlane.f32.xlu1 %v546_v7  ;;  %v1769_v8 = vadd.f32 %v525_v0, %v1635_v3  ;;  %v540_v9 = vsel %vm93_vm0, %v1761_v1, 0.0  ;;  %v557_v2 = vmul.f32 %v1761_v1, %v1761_v1 }
 0x552   :  { %v549_v5 = vsel %vm93_vm0, %v1764_v4, 0.0  ;;  %v560_v14 = vmul.f32 %v1764_v4, %v1764_v4  ;;  %v567_v24 = vsel %vm93_vm0, %v559_v13, 0.0 }
 0x553   :  { %550 = vadd.xlane.f32.xlu0 %v549_v5  ;;  %v543_v6 = vsel %vm93_vm0, %v1769_v8, 0.0  ;;  %v558_v12 = vmul.f32 %v1769_v8, %v1769_v8  ;;  %v561_v3 = vsel %vm93_vm0, %v557_v2, 0.0  ;;  %v1536_v2 = vld [vmem:[%s1963_s1 + $0x48] ss:$12 sps:$4 sm:$0xff]  }
 0x554   :  { %v570_v15 = vsel %vm93_vm0, %v560_v14, 0.0 }
 0x555   :  { %541 = vadd.xlane.f32.xlu1 %v540_v9  ;;  %v564_v28 = vsel %vm93_vm0, %v558_v12, 0.0  ;;  %v1535_v9 = vld [vmem:[%s1963_s1 + $0x30] ss:$12 sps:$4 sm:$0xff]   ;;  %v1538_v12 = vld [vmem:[%s1963_s1 + $0x78] ss:$12 sps:$4 sm:$0xff]  }
 0x556   :  { %1400 = vmatprep.subr.bf16.mxu0 %v1535_v9 }
 0x557   :  { %544 = vadd.xlane.f32.xlu0 %v543_v6  ;;  %1401 = vmatpush3.bf16.msra.mxu0 %v1535_v9  ;;  %v1537_v6 = vld [vmem:[%s1963_s1 + $0x60] ss:$12 sps:$4 sm:$0xff]  }
 0x558   :  { %1402 = vmatprep.subr.bf16.mxu0 %v1536_v2 }
 0x559   :  { %562 = vadd.xlane.f32.xlu1 %v561_v3  ;;  %v1238_v3 = vld [vmem:[%s1965_s2 + $0x4] ss:$0 sm:$0xff] }
 0x55b   :  { %565 = vadd.xlane.f32.xlu0 %v564_v28  ;;  %1403 = vmatpush3.bf16.msra.mxu0 %v1536_v2 }
 0x55c   :  { %1404 = vmatprep.subr.bf16.mxu0 %v1537_v6 }
 0x55d   :  { %568 = vadd.xlane.f32.xlu1 %v567_v24 }
 0x55f   :  { %571 = vadd.xlane.f32.xlu0 %v570_v15  ;;  %1405 = vmatpush3.bf16.msra.mxu0 %v1537_v6 }
 0x560   :  { %1406 = vmatprep.subr.bf16.mxu0 %v1538_v12 }
 0x563   :  { %1407 = vmatpush3.bf16.msra.mxu0 %v1538_v12 }
 0x5de   :  { %v548_v18 = vpop.xlane.xlu1 %547 }
 0x5df   :  { %v555_v26 = vmul.f32 0.03125, %v548_v18 }
 0x5e0   :  { %v551_v19 = vpop.xlane.xlu0 %550 }
 0x5e1   :  { %v556_v30 = vmul.f32 0.03125, %v551_v19  ;;  %v579_v36 = vmul.f32 %v555_v26, %v555_v26  ;;  %v587_v54 = vsub.f32 %v1758_v62, %v555_v26 }
 0x5e2   :  { %v542_v20 = vpop.xlane.xlu1 %541 }
 0x5e3   :  { %v553_v21 = vmul.f32 0.03125, %v542_v20  ;;  %v580_v40 = vmul.f32 %v556_v30, %v556_v30  ;;  %v588_v59 = vsub.f32 %v1764_v4, %v556_v30 }
 0x5e4   :  { %v545_v22 = vpop.xlane.xlu0 %544 }
 0x5e5   :  { %v554_v23 = vmul.f32 0.03125, %v545_v22  ;;  %v577_v27 = vmul.f32 %v553_v21, %v553_v21  ;;  %v585_v48 = vsub.f32 %v1761_v1, %v553_v21 }
 0x5e6   :  { %v563_v25 = vpop.xlane.xlu1 %562 }
 0x5e7   :  { %v573_v29 = vmul.f32 0.03125, %v563_v25  ;;  %v578_v32 = vmul.f32 %v554_v23, %v554_v23  ;;  %v586_v51 = vsub.f32 %v1769_v8, %v554_v23 }
 0x5e8   :  { %v566_v31 = vpop.xlane.xlu0 %565 }
 0x5e9   :  { %v581_v33 = vsub.f32 %v573_v29, %v577_v27  ;;  %v574_v34 = vmul.f32 0.03125, %v566_v31 }
 0x5ea   :  { %v569_v35 = vpop.xlane.xlu1 %568 }
 0x5eb   :  { %v589_v37 = vadd.f32 1e-12, %v581_v33  ;;  %v582_v38 = vsub.f32 %v574_v34, %v578_v32  ;;  %v575_v39 = vmul.f32 0.03125, %v569_v35 }
 0x5ec   :  { %v572_v41 = vpop.xlane.xlu0 %571 }
 0x5ed   :  { %1571 = vrsqrt.f32 %v589_v37  ;;  %v590_v42 = vadd.f32 1e-12, %v582_v38  ;;  %v583_v43 = vsub.f32 %v575_v39, %v579_v36  ;;  %v576_v44 = vmul.f32 0.03125, %v572_v41 }
 0x5ef   :  { %1573 = vrsqrt.f32 %v590_v42  ;;  %v591_v45 = vadd.f32 1e-12, %v583_v43  ;;  %v584_v46 = vsub.f32 %v576_v44, %v580_v40 }
 0x5f1   :  { %1575 = vrsqrt.f32 %v591_v45  ;;  %v592_v47 = vadd.f32 1e-12, %v584_v46 }
 0x5f3   :  { %1577 = vrsqrt.f32 %v592_v47 }
 0x5f7   :  { %v1572_v49 = vpop.eup %1571 }
 0x5f8   :  { %v597_v52 = vmul.f32 %v1572_v49, %v585_v48 }
 0x5f9   :  { %v1574_v53 = vpop.eup %1573 }
 0x5fa   :  { %v598_v55 = vmul.f32 %v1574_v53, %v586_v51  ;;  %v605_v56 = vmul.f32 %v1236_v50, %v597_v52 }
 0x5fb   :  { %v1576_v57 = vpop.eup %1575 }
 0x5fc   :  { %v606_v60 = vmul.f32 %v1236_v50, %v598_v55  ;;  %v599_v61 = vmul.f32 %v1576_v57, %v587_v54  ;;  %v1805_v11 = vadd.f32 %v1237_v58, %v605_v56 }
 0x5fd   :  { %v1578_v10 = vpop.eup %1577 }
 0x5fe   :  { %v1807_v63 = vadd.f32 %v1237_v58, %v606_v60  ;;  %v600_v0 = vmul.f32 %v1578_v10, %v588_v59  ;;  %v607_v1 = vmul.f32 %v1236_v50, %v599_v61  ;;  %v1243_v59 = vld [vmem:[%s1965_s2 + $0x5] ss:$0 sm:$0xff] }
 0x600   :  { %v617_v62 = vpack.c.bf16 %v1807_v63, %v1805_v11  ;;  %v608_v7 = vmul.f32 %v1236_v50, %v600_v0  ;;  %v1812_v8 = vadd.f32 %v1237_v58, %v607_v1 }
 0x602   :  { %1396 = vmatprep.mubr.msk.bf16.mxu1 %vm93_vm0, %v617_v62  ;;  %v1814_v5 = vadd.f32 %v1237_v58, %v608_v7 }
 0x604   :  { %v618_v4 = vpack.c.bf16 %v1814_v5, %v1812_v8 }
 0x606   :  { %1397 = vmatmul.mubr.msk.bf16.vlgmr.msra.gmra.mrb[0].mxu1 %vm93_vm0, %v618_v4 }
 0x6d9   :  { %v1398_v13 = vpop.f32.mrb[0].mxu1 }
 0x6da   :  { %v684_v28 = vadd.f32 %v1398_v13, %v1238_v3  ;;  %v675_v14 = vpop.f32.mrb[1].mxu1 }
 0x6db   :  { %v676_v24 = vadd.f32 %v1238_v3, %v675_v14  ;;  %v1399_v15 = vpop.f32.mrb[2].mxu1 }
 0x6dc   :  { %v696_v16 = vmul.f32 0.044715, %v684_v28  ;;  %v687_v17 = vadd.f32 %v1399_v15, %v1238_v3  ;;  %v678_v18 = vpop.f32.mrb[3].mxu1  ;;  %v692_v47 = vmul.f32 0.5, %v684_v28 }
 0x6dd   :  { %v694_v19 = vmul.f32 0.044715, %v676_v24  ;;  %v679_v20 = vadd.f32 %v1238_v3, %v678_v18  ;;  %v690_v50 = vmul.f32 0.5, %v676_v24  ;;  %v27_v18 = vld [vmem:[%s1964_s0 + $0x60] sm:$0xff] }
 0x6de   :  { %v700_v21 = vmul.f32 %v696_v16, %v684_v28  ;;  %v697_v22 = vmul.f32 0.044715, %v687_v17  ;;  %v693_v48 = vmul.f32 0.5, %v687_v17  ;;  %1420 = vmatprep.mubr.msk.f32.mxu1 %vm93_vm0, %v27_v18  ;;  %v39_v18 = vld [vmem:[%s1964_s0 + $0xc0] sm:$0xff] }
 0x6df   :  { %v698_v23 = vmul.f32 %v694_v19, %v676_v24  ;;  %v695_v25 = vmul.f32 0.044715, %v679_v20  ;;  %v691_v51 = vmul.f32 0.5, %v679_v20 }
 0x6e0   :  { %v704_v26 = vmul.f32 %v700_v21, %v684_v28  ;;  %v701_v27 = vmul.f32 %v697_v22, %v687_v17 }
 0x6e1   :  { %v702_v29 = vmul.f32 %v698_v23, %v676_v24  ;;  %v699_v30 = vmul.f32 %v695_v25, %v679_v20 }
 0x6e2   :  { %v708_v31 = vadd.f32 %v704_v26, %v684_v28  ;;  %v705_v32 = vmul.f32 %v701_v27, %v687_v17 }
 0x6e3   :  { %v706_v33 = vadd.f32 %v702_v29, %v676_v24  ;;  %v703_v34 = vmul.f32 %v699_v30, %v679_v20 }
 0x6e4   :  { %v712_v35 = vmul.f32 0.7978846, %v708_v31  ;;  %v709_v36 = vadd.f32 %v705_v32, %v687_v17 }
 0x6e5   :  { %v710_v37 = vmul.f32 0.7978846, %v706_v33  ;;  %v707_v38 = vadd.f32 %v703_v34, %v679_v20 }
 0x6e6   :  { %1579 = vtanh.f32 %v712_v35  ;;  %v713_v39 = vmul.f32 0.7978846, %v709_v36 }
 0x6e7   :  { %1581 = vtanh.f32 %v710_v37  ;;  %v711_v40 = vmul.f32 0.7978846, %v707_v38 }
 0x6e8   :  { %1583 = vtanh.f32 %v713_v39 }
 0x6e9   :  { %1585 = vtanh.f32 %v711_v40 }
 0x6f0   :  { %v1580_v41 = vpop.eup %1579 }
 0x6f1   :  { %v1582_v42 = vpop.eup %1581  ;;  %v720_v43 = vadd.f32 1.0, %v1580_v41 }
 0x6f2   :  { %v1584_v44 = vpop.eup %1583  ;;  %v718_v45 = vadd.f32 1.0, %v1582_v42 }
 0x6f3   :  { %v1586_v46 = vpop.eup %1585  ;;  %v721_v49 = vadd.f32 1.0, %v1584_v44  ;;  %v724_v53 = vmul.f32 %v720_v43, %v692_v47 }
 0x6f4   :  { %v719_v52 = vadd.f32 1.0, %v1586_v46  ;;  %v722_v55 = vmul.f32 %v718_v45, %v690_v50 }
 0x6f5   :  { %v725_v54 = vmul.f32 %v721_v49, %v693_v48 }
 0x6f6   :  { %v723_v56 = vmul.f32 %v719_v52, %v691_v51  ;;  %v1250_v51 = vld [vmem:[%s1965_s2 + $0x6] ss:$0 sm:$0xff] }
 0x6f7   :  { %v727_v57 = vpack.c.bf16 %v725_v54, %v724_v53 }
 0x6f8   :  { %v726_v58 = vpack.c.bf16 %v723_v56, %v722_v55 }
 0x6fa   :  { %1408 = vmatprep.mubr.msk.bf16.mxu0 %vm756_vm1, %v726_v58 }
 0x6fb   :  { %1409 = vmatmul.mubr.msk.bf16.vlgmr.msra.gmra.mrb[24].mxu0 %vm756_vm1, %v727_v57 }
 0x7ce   :  { %v1410_v60 = vpop.f32.mrb[24].mxu0 }
 0x7cf   :  { %v806_v61 = vadd.f32 %v1410_v60, %v1243_v59  ;;  %v797_v10 = vpop.f32.mrb[25].mxu0 }
 0x7d0   :  { %v798_v0 = vadd.f32 %v1243_v59, %v797_v10  ;;  %v1411_v1 = vpop.f32.mrb[26].mxu0 }
 0x7d1   :  { %v1838_v62 = vadd.f32 %v806_v61, %v1812_v8  ;;  %v809_v7 = vadd.f32 %v1411_v1, %v1243_v59  ;;  %v800_v4 = vpop.f32.mrb[27].mxu0 }
 0x7d2   :  { %v801_v9 = vadd.f32 %v1243_v59, %v800_v4  ;;  %v812_v2 = vadd.f32 %v798_v0, %v1805_v11  ;;  %v1251_v59 = vld [vmem:[%s1965_s2 + $0x7] ss:$0 sm:$0xff] }
 0x7d3   :  { %v1842_v6 = vadd.f32 %v809_v7, %v1814_v5  ;;  %v822_v12 = vsel %vm93_vm0, %v1838_v62, 0.0  ;;  %v834_v24 = vmul.f32 %v1838_v62, %v1838_v62 }
 0x7d4   :  { %823 = vadd.xlane.f32.xlu1 %v822_v12  ;;  %v813_v3 = vadd.f32 %v801_v9, %v1807_v63  ;;  %v816_v8 = vsel %vm93_vm0, %v812_v2, 0.0  ;;  %v832_v28 = vmul.f32 %v812_v2, %v812_v2 }
 0x7d5   :  { %v825_v13 = vsel %vm93_vm0, %v1842_v6, 0.0  ;;  %v835_v15 = vmul.f32 %v1842_v6, %v1842_v6  ;;  %v842_v16 = vsel %vm93_vm0, %v834_v24, 0.0  ;;  %v34_v24 = vld [vmem:[%s1964_s0 + $0x98] sm:$0xff] }
 0x7d6   :  { %826 = vadd.xlane.f32.xlu0 %v825_v13  ;;  %v819_v14 = vsel %vm93_vm0, %v813_v3, 0.0  ;;  %v833_v11 = vmul.f32 %v813_v3, %v813_v3  ;;  %v836_v5 = vsel %vm93_vm0, %v832_v28, 0.0  ;;  %v30_v28 = vld [vmem:[%s1964_s0 + $0x78] sm:$0xff] }
 0x7d7   :  { %v845_v17 = vsel %vm93_vm0, %v835_v15, 0.0  ;;  %v36_v15 = vld [vmem:[%s1964_s0 + $0xa8] sm:$0xff] }
 0x7d8   :  { %817 = vadd.xlane.f32.xlu1 %v816_v8  ;;  %v839_v63 = vsel %vm93_vm0, %v833_v11, 0.0  ;;  %v29_v8 = vld [vmem:[%s1964_s0 + $0x70] sm:$0xff]  ;;  %v32_v11 = vld [vmem:[%s1964_s0 + $0x88] sm:$0xff] }
 0x7da   :  { %820 = vadd.xlane.f32.xlu0 %v819_v14  ;;  %v31_v14 = vld [vmem:[%s1964_s0 + $0x80] sm:$0xff] }
 0x7dc   :  { %837 = vadd.xlane.f32.xlu1 %v836_v5  ;;  %v33_v5 = vld [vmem:[%s1964_s0 + $0x90] sm:$0xff] }
 0x7de   :  { %840 = vadd.xlane.f32.xlu0 %v839_v63  ;;  %v35_v63 = vld [vmem:[%s1964_s0 + $0xa0] sm:$0xff] }
 0x7e0   :  { %843 = vadd.xlane.f32.xlu1 %v842_v16  ;;  %v37_v16 = vld [vmem:[%s1964_s0 + $0xb0] sm:$0xff] }
 0x7e2   :  { %846 = vadd.xlane.f32.xlu0 %v845_v17  ;;  %v38_v17 = vld [vmem:[%s1964_s0 + $0xb8] sm:$0xff] }
 0x861   :  { %v824_v19 = vpop.xlane.xlu1 %823 }
 0x862   :  { %v830_v27 = vmul.f32 0.03125, %v824_v19  ;;  %v40_v19 = vld [vmem:[%s1964_s0 + $0xc8] sm:$0xff] }
 0x863   :  { %v827_v20 = vpop.xlane.xlu0 %826 }
 0x864   :  { %v831_v31 = vmul.f32 0.03125, %v827_v20  ;;  %v854_v37 = vmul.f32 %v830_v27, %v830_v27  ;;  %v862_v55 = vsub.f32 %v1838_v62, %v830_v27  ;;  %v41_v20 = vld [vmem:[%s1964_s0 + $0xd0] sm:$0xff] }
 0x865   :  { %v818_v21 = vpop.xlane.xlu1 %817 }
 0x866   :  { %v828_v22 = vmul.f32 0.03125, %v818_v21  ;;  %v855_v41 = vmul.f32 %v831_v31, %v831_v31  ;;  %v863_v60 = vsub.f32 %v1842_v6, %v831_v31  ;;  %v28_v6 = vld [vmem:[%s1964_s0 + $0x68] sm:$0xff]  ;;  %v42_v21 = vld [vmem:[%s1964_s0 + $0xd8] sm:$0xff] }
 0x867   :  { %v821_v23 = vpop.xlane.xlu0 %820 }
 0x868   :  { %v829_v25 = vmul.f32 0.03125, %v821_v23  ;;  %v852_v29 = vmul.f32 %v828_v22, %v828_v22  ;;  %v860_v49 = vsub.f32 %v812_v2, %v828_v22  ;;  %v1597_v22 = vmov 0.0|0.0  }
 0x869   :  { %v838_v26 = vpop.xlane.xlu1 %837  ;;  %v1599_v23 = vmov 0.0  }
 0x86a   :  { %v848_v30 = vmul.f32 0.03125, %v838_v26  ;;  %v853_v33 = vmul.f32 %v829_v25, %v829_v25  ;;  %v861_v52 = vsub.f32 %v813_v3, %v829_v25  ;;  %v72_v25 = vld [vmem:[%s1965_s2 + $0x9] sm:$0x1]  ;;  %v1600_v26 = vmov 0  }
 0x86b   :  { %v841_v32 = vpop.xlane.xlu0 %840  ;;  %1527 = vset.pattern.permute.xlu1 %v1600_v26  ;;  %1528 = vset.pattern.permute.xlu0 %v1600_v26 }
 0x86c   :  { %v856_v34 = vsub.f32 %v848_v30, %v852_v29  ;;  %v849_v35 = vmul.f32 0.03125, %v841_v32  ;;  %1087 = vperm.xlu1 %1527, %v72_v25  }
 0x86d   :  { %v844_v36 = vpop.xlane.xlu1 %843 }
 0x86e   :  { %v864_v38 = vadd.f32 1e-12, %v856_v34  ;;  %v857_v39 = vsub.f32 %v849_v35, %v853_v33  ;;  %v850_v40 = vmul.f32 0.03125, %v844_v36 }
 0x86f   :  { %v847_v42 = vpop.xlane.xlu0 %846 }
 0x870   :  { %1587 = vrsqrt.f32 %v864_v38  ;;  %v865_v43 = vadd.f32 1e-12, %v857_v39  ;;  %v858_v44 = vsub.f32 %v850_v40, %v854_v37  ;;  %v851_v45 = vmul.f32 0.03125, %v847_v42 }
 0x872   :  { %1589 = vrsqrt.f32 %v865_v43  ;;  %v866_v46 = vadd.f32 1e-12, %v858_v44  ;;  %v859_v47 = vsub.f32 %v851_v45, %v855_v41 }
 0x874   :  { %1591 = vrsqrt.f32 %v866_v46  ;;  %v867_v48 = vadd.f32 1e-12, %v859_v47 }
 0x876   :  { %1593 = vrsqrt.f32 %v867_v48 }
 0x87a   :  { %v1588_v50 = vpop.eup %1587 }
 0x87b   :  { %v872_v53 = vmul.f32 %v1588_v50, %v860_v49 }
 0x87c   :  { %v1590_v54 = vpop.eup %1589 }
 0x87d   :  { %v873_v56 = vmul.f32 %v1590_v54, %v861_v52  ;;  %v880_v57 = vmul.f32 %v1250_v51, %v872_v53  ;;  %v71_v53 = vld [vmem:[%s1965_s2 + $0x8] sm:$0x1] }
 0x87e   :  { %v1592_v58 = vpop.eup %1591 }
 0x87f   :  { %v881_v61 = vmul.f32 %v1250_v51, %v873_v56  ;;  %v874_v10 = vmul.f32 %v1592_v58, %v862_v55  ;;  %v888_v1 = vadd.f32 %v1251_v59, %v880_v57 }
 0x880   :  { %v1594_v0 = vpop.eup %1593 }
 0x881   :  { %v889_v7 = vadd.f32 %v1251_v59, %v881_v61  ;;  %v875_v4 = vmul.f32 %v1594_v0, %v863_v60  ;;  %v882_v9 = vmul.f32 %v1250_v51, %v874_v10 }
 0x883   :  { %v1479_v2 = vpack.c.bf16 %v889_v7, %v888_v1  ;;  %v883_v12 = vmul.f32 %v1250_v51, %v875_v4  ;;  %v890_v62 = vadd.f32 %v1251_v59, %v882_v9 }
 0x885   :  { %1480 = vmatprep.subr.bf16.mxu1 %v1479_v2  ;;  %v891_v3 = vadd.f32 %v1251_v59, %v883_v12 }
 0x886   :  { %1482 = vmatpush3.bf16.msra.mxu1 %v1479_v2 }
 0x887   :  { %v1483_v13 = vpack.c.bf16 %v891_v3, %v890_v62 }
 0x889   :  { %1484 = vmatprep.subr.bf16.mxu1 %v1483_v13 }
 0x88a   :  { %1486 = vmatpush3.bf16.msra.mxu1 %v1483_v13 }
 0x88b   :  { %1487 = vmatprep.subr.bf16.mxu1 %v1597_v22 }
 0x88d   :  { %1421 = vmatmul.mubr.msk.f32.vlgmr.msra.gmra.mrb[4].mxu1 %vm93_vm0, %v28_v6 }
 0x88e   :  { %1423 = vmatprep.mubr.msk.f32.mxu1 %vm93_vm0, %v29_v8 }
 0x891   :  { %1424 = vmatmul.mubr.msk.f32.gmra.mrb[6].mxu1 %vm93_vm0, %v30_v28 }
 0x892   :  { %1426 = vmatprep.mubr.msk.f32.mxu1 %vm93_vm0, %v31_v14 }
 0x895   :  { %1427 = vmatmul.mubr.msk.f32.gmra.mrb[8].mxu1 %vm93_vm0, %v32_v11 }
 0x896   :  { %1429 = vmatprep.mubr.msk.f32.mxu1 %vm93_vm0, %v33_v5 }
 0x899   :  { %1430 = vmatmul.mubr.msk.f32.gmra.mrb[10].mxu1 %vm93_vm0, %v34_v24 }
 0x89a   :  { %1432 = vmatprep.mubr.msk.f32.mxu1 %vm93_vm0, %v35_v63 }
 0x89d   :  { %1433 = vmatmul.mubr.msk.f32.gmra.mrb[12].mxu1 %vm93_vm0, %v36_v15 }
 0x89e   :  { %1435 = vmatprep.mubr.msk.f32.mxu1 %vm93_vm0, %v37_v16 }
 0x8a1   :  { %1436 = vmatmul.mubr.msk.f32.gmra.mrb[14].mxu1 %vm93_vm0, %v38_v17 }
 0x8a2   :  { %1438 = vmatprep.mubr.msk.f32.mxu1 %vm93_vm0, %v39_v18 }
 0x8a5   :  { %1439 = vmatmul.mubr.msk.f32.gmra.mrb[16].mxu1 %vm93_vm0, %v40_v19 }
 0x8a6   :  { %1441 = vmatprep.mubr.msk.f32.mxu1 %vm93_vm0, %v41_v20 }
 0x8a9   :  { %1442 = vmatmul.mubr.msk.f32.gmra.mrb[18].mxu1 %vm93_vm0, %v42_v21 }
 0x8aa   :  { %1476 = vmatprep.mubr.msk.f32.mxu1 %vm1598_vm2, %v1599_v23 }
 0x8eb   :  { %v1088_v54 = vpop.permute.xlu1 %1087 }
 0x960   :  { %v1422_v27 = vpop.f32.mrb[4].mxu1 }
 0x961   :  { %v1006_v29 = vpop.f32.mrb[5].mxu1 }
 0x962   :  { %v1488_v31 = vpack.c.bf16 %v1422_v27, %v1006_v29 }
 0x964   :  { %1490 = vmatpush3.bf16.xpose.msk.msra.mxu1 %vm1936_vm3, %v1488_v31  ;;  %v1425_v32 = vpop.f32.mrb[6].mxu1 }
 0x965   :  { %v1016_v33 = vpop.f32.mrb[7].mxu1  ;;  %1491 = vmatprep.subr.bf16.mxu1 %v1597_v22 }
 0x966   :  { %v1492_v34 = vpack.c.bf16 %v1425_v32, %v1016_v33 }
 0x968   :  { %v1428_v35 = vpop.f32.mrb[8].mxu1 }
 0x969   :  { %v1026_v36 = vpop.f32.mrb[9].mxu1 }
 0x96a   :  { %v1496_v37 = vpack.c.bf16 %v1428_v35, %v1026_v36 }
 0x96c   :  { %1494 = vmatpush3.bf16.xpose.msk.msra.mxu1 %vm1936_vm3, %v1492_v34  ;;  %v1431_v38 = vpop.f32.mrb[10].mxu1 }
 0x96d   :  { %1495 = vmatprep.subr.bf16.mxu1 %v1597_v22  ;;  %v1036_v39 = vpop.f32.mrb[11].mxu1 }
 0x96e   :  { %v1500_v40 = vpack.c.bf16 %v1431_v38, %v1036_v39 }
 0x970   :  { %v1434_v41 = vpop.f32.mrb[12].mxu1 }
 0x971   :  { %v1046_v42 = vpop.f32.mrb[13].mxu1 }
 0x972   :  { %v1504_v43 = vpack.c.bf16 %v1434_v41, %v1046_v42 }
 0x974   :  { %1498 = vmatpush3.bf16.xpose.msk.msra.mxu1 %vm1936_vm3, %v1496_v37  ;;  %v1437_v44 = vpop.f32.mrb[14].mxu1 }
 0x975   :  { %1499 = vmatprep.subr.bf16.mxu1 %v1597_v22  ;;  %v1056_v45 = vpop.f32.mrb[15].mxu1 }
 0x976   :  { %v1508_v46 = vpack.c.bf16 %v1437_v44, %v1056_v45 }
 0x978   :  { %v1440_v47 = vpop.f32.mrb[16].mxu1 }
 0x979   :  { %v1066_v48 = vpop.f32.mrb[17].mxu1 }
 0x97a   :  { %v1512_v49 = vpack.c.bf16 %v1440_v47, %v1066_v48 }
 0x97c   :  { %1502 = vmatpush3.bf16.xpose.msk.msra.mxu1 %vm1936_vm3, %v1500_v40  ;;  %v1443_v50 = vpop.f32.mrb[18].mxu1 }
 0x97d   :  { %1503 = vmatprep.subr.bf16.mxu1 %v1597_v22  ;;  %v1076_v51 = vpop.f32.mrb[19].mxu1 }
 0x97e   :  { %v1516_v52 = vpack.c.bf16 %v1443_v50, %v1076_v51 }
 0x984   :  { %1506 = vmatpush3.bf16.xpose.msk.msra.mxu1 %vm1936_vm3, %v1504_v43 }
 0x985   :  { %1507 = vmatprep.subr.bf16.mxu1 %v1597_v22 }
 0x98c   :  { %1510 = vmatpush3.bf16.xpose.msk.msra.mxu1 %vm1936_vm3, %v1508_v46 }
 0x98d   :  { %1511 = vmatprep.subr.bf16.mxu1 %v1597_v22 }
 0x994   :  { %1514 = vmatpush3.bf16.xpose.msk.msra.mxu1 %vm1936_vm3, %v1512_v49 }
 0x995   :  { %1515 = vmatprep.subr.bf16.mxu1 %v1597_v22 }
 0x99c   :  { %1518 = vmatpush3.bf16.xpose.msk.msra.mxu1 %vm1936_vm3, %v1516_v52 }
 0x9a3   :  { %1477 = vmatmul.mubr.msk.f32.vlgmr.msra.gmra.mrb[20].mxu1 %vm93_vm0, %v71_v53 }
 0xa76   :  { %v1207_v55 = vpop.f32.mrb[20].mxu1 }
 0xa77   :  { %v1478_v56 = vpop.f32.mrb[21].mxu1  ;;  %v1208_v57 = vadd.f32 %v1207_v55, %v1088_v54 }
 0xa79   :  { %1211 = vst [vmem:[%s1966_s3] sm:$0x1] %v1208_v57 }

</bundles_post_ra>
